<compile_context>
chip_gen: v6e
topology: v6e:2x2x1
jax: 0.10.0
libtpu: 0.0.40
codegen_flags: <defaults>
</compile_context>

<pallas_src>
import jax
import jax.numpy as jnp
from jax import lax
from jax.experimental import pallas as pl
from jax.experimental.pallas import tpu as pltpu


def _round_up(x, m):
    return ((x + m - 1) // m) * m


def _vmem_budget_bytes():
    """Usable scoped-VMEM budget for this TPU generation (physical minus headroom)."""
    cap = 64 * 1024 * 1024                    # conservative default (v7x physical VMEM)
    try:
        info = pltpu.get_tpu_info()
        cap = int(getattr(info, "vmem_capacity_bytes", cap))
    except Exception:
        pass
    return int(cap * 0.85)                    # ~15% headroom for compiler temporaries


def _vmem_limit(est_bytes, budget):
    # Size from the actual (double-buffered) block bytes + ~30% headroom,
    # clamped to the per-generation budget.  No hard 32 MiB cap.
    return int(min(budget, max(16 * 1024 * 1024, int(est_bytes * 1.3))))


# --------------------------------------------------------------------------
# Kernel 1: normalized similarity + masked quantile matrix, tiled output.
# --------------------------------------------------------------------------
def _make_sim_kernel(temperature):
    inv_t = 1.0 / temperature
    two_over_t = 2.0 / temperature

    def kernel(a_ref, b_ref, rlab_ref, clab_ref, rsid_ref, csid_ref,
               sim_ref, temp_ref):
        # Features are already L2-normalized (hoisted out of the (i, j) grid).
        # TODO(synk): optional bf16 cast (keeping f32 accumulation) for ~3x MXU
        # rate; kept f32 so the quantile thresholding matches the torch reference.
        s = lax.dot_general(
            a_ref[...], b_ref[...],
            dimension_numbers=(((1,), (1,)), ((), ())),
            preferred_element_type=jnp.float32) * inv_t
        sim_ref[...] = s
        # temp = (sim + 2/T) * same_label * (1 - aug); the diagonal is inside
        # aug (same sample id), so no explicit eye/iota is needed here.
        keep = jnp.logical_and(rlab_ref[...] == clab_ref[...],
                               rsid_ref[...] != csid_ref[...])
        temp_ref[...] = jnp.where(keep, s + two_over_t, 0.0)

    return kernel


# --------------------------------------------------------------------------
# Kernel 2: fused mask construction + log-softmax + per-row loss (row strips).
# --------------------------------------------------------------------------
def _make_loss_kernel(temperature, base_temperature, n_real, block_rows):
    scale = temperature / base_temperature

    def kernel(s_ref, rlab_ref, clab_ref, rsid_ref, csid_ref, thr_ref, o_ref):
        pid = pl.program_id(0)
        s = s_ref[...]          # (TR, Npad) f32   anchor_dot_contrast (already / T)
        rlab = rlab_ref[...]    # (TR, 1)   int32  row labels (-1 for padding)
        clab = clab_ref[...]    # (1, Npad) int32  col labels (-1 for padding)
        rsid = rsid_ref[...]    # (TR, 1)   int32  row sample index (i % B)
        csid = csid_ref[...]    # (1, Npad) int32  col sample index (j % B)
        thr = thr_ref[...]      # (TR, 1)   f32    per-row quantile - 2/T

        npad = s.shape[-1]
        row_idx = pid * block_rows + lax.broadcasted_iota(
            jnp.int32, (block_rows, 1), 0)
        col_idx = lax.broadcasted_iota(jnp.int32, (1, npad), 1)

        col_valid = col_idx < n_real                          # (1, Npad) bool
        not_self = row_idx != col_idx                         # (TR, Npad) bool
        logits_mask = jnp.logical_and(not_self, col_valid)    # bool
        pos = jnp.logical_and(rlab == clab, logits_mask)      # bool
        aug = rsid == csid                                    # bool
        # temp > quant  <=>  s > quant - 2/T on positive non-aug entries
        # (up to f32 rounding at exact-boundary ties).
        final = jnp.logical_and(pos, jnp.logical_or(aug, s > thr))

        # Padded columns of s are exactly 0 and every real row contains its own
        # diagonal (= 1/T > 0), so the plain row max equals the masked max.
        row_max = jnp.max(s, axis=-1, keepdims=True)
        logits = s - row_max
        exp_logits = jnp.where(logits_mask, jnp.exp(logits), 0.0)
        log_denom = jnp.log(jnp.sum(exp_logits, axis=-1, keepdims=True))
        log_prob = logits - log_denom

        num = jnp.sum(jnp.where(final, log_prob, 0.0), axis=-1, keepdims=True)
        den = jnp.sum(jnp.where(final, 1.0, 0.0), axis=-1, keepdims=True)
        # Guard only fires for rows with zero positives (where the torch
        # reference would produce NaN) and for padded rows.
        mean_log_prob = jnp.where(den > 0.0, num / jnp.maximum(den, 1e-12), 0.0)
        row_valid = row_idx < n_real
        o_ref[...] = jnp.where(row_valid, -scale * mean_log_prob, 0.0)

    return kernel


def _interp_quantile(sorted_rows, n, q_level):
    """torch.quantile('linear') over the last n[i] columns of each ascending row."""
    ncols = sorted_rows.shape[-1]
    pos = q_level * (n - 1.0)
    lo = jnp.floor(pos)
    frac = pos - lo
    base = ncols - n
    idx_lo = jnp.clip(base + lo, 0, ncols - 1).astype(jnp.int32)
    idx_hi = jnp.clip(base + jnp.ceil(pos), 0, ncols - 1).astype(jnp.int32)
    v_lo = jnp.take_along_axis(sorted_rows, idx_lo[:, None], axis=-1)[:, 0]
    v_hi = jnp.take_along_axis(sorted_rows, idx_hi[:, None], axis=-1)[:, 0]
    return v_lo + frac * (v_hi - v_lo)


def supcon_loss(features, labels, thresh=0.0, *, rng_key,
                temperature=0.07, contrast_mode='all', base_temperature=0.07):
    if features.ndim < 3:
        raise ValueError('`features` needs to be [bsz, n_views, ...]')
    B, V = features.shape[0], features.shape[1]
    feats = features.reshape(B, V, -1).astype(jnp.float32)
    D = feats.shape[-1]
    if labels.shape[0] != B:
        raise ValueError('Num of labels does not match num of features')
    if contrast_mode != 'all':
        raise ValueError('only contrast_mode="all" implemented')

    labels = labels.astype(jnp.int32)
    N = V * B
    contrast_feature = jnp.transpose(feats, (1, 0, 2)).reshape(N, D)

    # ---- hoisted L2 normalization: once over [N, D], not once per output tile.
    # F.normalize(dim=-1): x / max(||x||, 1e-12) == x * rsqrt(max(||x||^2, 1e-24))
    sq = jnp.sum(contrast_feature * contrast_feature, axis=-1, keepdims=True)
    contrast_feature = contrast_feature * lax.rsqrt(jnp.maximum(sq, 1e-24))

    # ---- padding: lane-dense feature dim, 128-aligned N (zeros don't change A.A^T)
    D_pad = _round_up(D, 128)
    N_pad = _round_up(N, 128)
    feats_pad = jnp.zeros((N_pad, D_pad), jnp.float32).at[:N, :D].set(contrast_feature)

    tiled_labels = jnp.tile(labels, V)                                    # [N]
    sid = jnp.arange(N, dtype=jnp.int32) % B                              # [N]
    labels_pad = jnp.full((N_pad,), -1, jnp.int32).at[:N].set(tiled_labels)
    sid_pad = jnp.full((N_pad,), -1, jnp.int32).at[:N].set(sid)
    row_labels = labels_pad.reshape(N_pad, 1)
    col_labels = labels_pad.reshape(1, N_pad)
    row_sid = sid_pad.reshape(N_pad, 1)
    col_sid = sid_pad.reshape(1, N_pad)

    budget = _vmem_budget_bytes()

    # ---- Pallas kernel 1: tiled N x N similarity / T  +  masked "temp" matrix ----
    def pick_mm_tile():
        for t in (512, 256, 128):
            if N_pad % t:
                continue
            est = 4 * (2 * 2 * t * D_pad      # A,B blocks, double-buffered
                       + 2 * 2 * t * t        # two (t,t) f32 outputs, double-buffered
                       + 4 * t * t)           # in-kernel temporaries
            if est <= 0.7 * budget:
                return t, est
        t = 128
        return t, 4 * (2 * 2 * t * D_pad + 2 * 2 * t * t + 4 * t * t)

    # TODO(synk): for very large D on v7x (64 MiB VMEM) add a K-reduction grid
    # axis with a VMEM accumulator instead of only shrinking TM/TN.
    TM, est1 = pick_mm_tile()
    TN = TM
    sim_pad, temp_pad = pl.pallas_call(
        _make_sim_kernel(temperature),
        out_shape=(jax.ShapeDtypeStruct((N_pad, N_pad), jnp.float32),
                   jax.ShapeDtypeStruct((N_pad, N_pad), jnp.float32)),
        grid=(N_pad // TM, N_pad // TN),
        in_specs=[pl.BlockSpec((TM, D_pad), lambda i, j: (i, 0)),
                  pl.BlockSpec((TN, D_pad), lambda i, j: (j, 0)),
                  pl.BlockSpec((TM, 1), lambda i, j: (i, 0)),
                  pl.BlockSpec((1, TN), lambda i, j: (0, j)),
                  pl.BlockSpec((TM, 1), lambda i, j: (i, 0)),
                  pl.BlockSpec((1, TN), lambda i, j: (0, j))],
        out_specs=[pl.BlockSpec((TM, TN), lambda i, j: (i, j)),
                   pl.BlockSpec((TM, TN), lambda i, j: (i, j))],
        compiler_params=pltpu.CompilerParams(
            dimension_semantics=("parallel", "parallel"),
            vmem_limit_bytes=_vmem_limit(est1, budget)),
    )(feats_pad, feats_pad, row_labels, col_labels, row_sid, col_sid)

    # ---- XLA glue: per-row probabilistic quantile thresholds ----
    # TODO(synk): replace the full per-row sort with lax.top_k(k = max positives
    # per row) once a static per-class-count bound is plumbed through; the sort
    # is the asymptotic O(N^2 log N) bottleneck at large N.
    temp = temp_pad[:N, :N]
    sorted_temp = jnp.sort(temp, axis=-1)                     # ascending per row
    # positives-per-row from the tiny B x B label matrix (no N x N masks needed):
    # n_pos = n_views * (same-label-sample-count - 1)
    counts = jnp.sum((labels[:, None] == labels[None, :]).astype(jnp.float32), axis=-1)
    n_pos = jnp.tile(V * (counts - 1.0), V)                   # [N]
    n_safe = jnp.maximum(n_pos, 1.0)

    q = 1.0 - thresh
    q_lower = jnp.floor(n_safe * q) / n_safe
    q_higher = jnp.ceil(n_safe * q) / n_safe
    lower = _interp_quantile(sorted_temp, n_safe, q_lower)
    higher = _interp_quantile(sorted_temp, n_safe, q_higher)
    prob = n_safe * q - jnp.floor(n_safe * q)
    # TODO(synk): torch draws this Bernoulli from CUDA's RNG stream; jax.random
    # gives the same distribution but a different stream.
    u = jax.random.uniform(rng_key, (N,), dtype=jnp.float32)
    quantiles = jnp.where(u < prob, higher, lower)
    thr = quantiles - 2.0 / temperature                        # compare s > thr in-kernel
    thr_pad = jnp.zeros((N_pad,), jnp.float32).at[:N].set(thr).reshape(N_pad, 1)

    # ---- Pallas kernel 2: row-strip fused masking + log-softmax + per-row loss ----
    def pick_row_strip():
        for t in (512, 256, 128, 64, 32, 16, 8):
            if N_pad % t:
                continue
            est = 4 * N_pad * (2 * t      # strip, double-buffered
                               + 6 * t    # in-kernel (TR, Npad) temporaries
                               + 4)       # per-column vectors
            if est <= 0.7 * budget:
                return t, est
        t = 8
        return t, 4 * N_pad * (2 * t + 6 * t + 4)

    # TODO(synk): for very large N, add a column-block grid axis with online
    # max/denominator accumulation (flash-style) so VMEM use is independent of N.
    TR, est2 = pick_row_strip()
    row_losses = pl.pallas_call(
        _make_loss_kernel(temperature, base_temperature, N, TR),
        out_shape=jax.ShapeDtypeStruct((N_pad, 1), jnp.float32),
        grid=(N_pad // TR,),
        in_specs=[
            pl.BlockSpec((TR, N_pad), lambda i: (i, 0)),   # similarity strip
            pl.BlockSpec((TR, 1), lambda i: (i, 0)),       # row labels
            pl.BlockSpec((1, N_pad), lambda i: (0, 0)),    # col labels
            pl.BlockSpec((TR, 1), lambda i: (i, 0)),       # row sample ids
            pl.BlockSpec((1, N_pad), lambda i: (0, 0)),    # col sample ids
            pl.BlockSpec((TR, 1), lambda i: (i, 0)),       # per-row thresholds
        ],
        out_specs=pl.BlockSpec((TR, 1), lambda i: (i, 0)),
        compiler_params=pltpu.CompilerParams(
            dimension_semantics=("parallel",),             # megacore-shardable on v7x
            vmem_limit_bytes=_vmem_limit(est2, budget)),
    )(sim_pad, row_labels, col_labels, row_sid, col_sid, thr_pad)

    # loss.view(anchor_count, batch_size).mean() == sum over all N rows / N
    return jnp.sum(row_losses) / float(N)


if __name__ == "__main__":
    key = jax.random.PRNGKey(0)
    kf, kl, kq = jax.random.split(key, 3)
    B, V, D = 8, 2, 32
    features = jax.random.normal(kf, (B, V, D), dtype=jnp.float32)
    # 4 classes, 2 samples each (each class needs >= 2 samples, as in the torch code)
    labels = jax.random.permutation(kl, jnp.repeat(jnp.arange(4, dtype=jnp.int32), 2))

    loss_unsup = supcon_loss(features, labels, thresh=0.0, rng_key=kq)   # SimCLR-like
    loss_semi = supcon_loss(features, labels, thresh=0.5, rng_key=kq)    # partial supervision
    jax.block_until_ready((loss_unsup, loss_semi))
    assert bool(jnp.isfinite(loss_unsup)) and bool(jnp.isfinite(loss_semi))
    print("KERNEL_OK")
</pallas_src>

<mosaic_0001>
module attributes {stable_mosaic.version = 11 : i64} {
  func.func @kernel(%arg0: i32, %arg1: i32, %arg2: memref<128x128xf32, #tpu.memory_space<vmem>>, %arg3: memref<128x128xf32, #tpu.memory_space<vmem>>, %arg4: memref<128x1xi32, #tpu.memory_space<vmem>>, %arg5: memref<1x128xi32, #tpu.memory_space<vmem>>, %arg6: memref<128x1xi32, #tpu.memory_space<vmem>>, %arg7: memref<1x128xi32, #tpu.memory_space<vmem>>, %arg8: memref<128x128xf32, #tpu.memory_space<vmem>>, %arg9: memref<128x128xf32, #tpu.memory_space<vmem>>) attributes {dimension_semantics = [#tpu.dimension_semantics<parallel>, #tpu.dimension_semantics<parallel>], iteration_bounds = array<i64: 1, 1>, scalar_prefetch = 0 : i64, scratch_operands = 0 : i64, tpu.core_type = #tpu.core_type<tc>, window_params = [{transform_indices = @transform_0, window_bounds = array<i64: 128, 128>}, {transform_indices = @transform_1, window_bounds = array<i64: 128, 128>}, {transform_indices = @transform_2, window_bounds = array<i64: 128, 1>}, {transform_indices = @transform_3, window_bounds = array<i64: 1, 128>}, {transform_indices = @transform_4, window_bounds = array<i64: 128, 1>}, {transform_indices = @transform_5, window_bounds = array<i64: 1, 128>}, {transform_indices = @transform_6, window_bounds = array<i64: 128, 128>}, {transform_indices = @transform_7, window_bounds = array<i64: 128, 128>}]} {
    %c0 = arith.constant 0 : index
    %c0_0 = arith.constant 0 : index
    %0 = vector.load %arg2[%c0, %c0_0] : memref<128x128xf32, #tpu.memory_space<vmem>>, vector<128x128xf32>
    %c0_1 = arith.constant 0 : index
    %c0_2 = arith.constant 0 : index
    %1 = vector.load %arg3[%c0_1, %c0_2] : memref<128x128xf32, #tpu.memory_space<vmem>>, vector<128x128xf32>
    %cst = arith.constant dense<0.000000e+00> : vector<128x128xf32>
    %2 = tpu.matmul %0, %1, %cst {dimension_numbers = #tpu.dot_dimension_numbers<[1], [1], [0], [0], [0, 0, 1, 0], [], []>} : vector<128x128xf32>, vector<128x128xf32>, vector<128x128xf32> -> vector<128x128xf32>
    %cst_3 = arith.constant 14.2857141 : f32
    %3 = vector.broadcast %cst_3 : f32 to vector<128x128xf32>
    %4 = arith.mulf %2, %3 : vector<128x128xf32>
    %c0_4 = arith.constant 0 : index
    %c0_5 = arith.constant 0 : index
    %5 = vector.load %arg8[%c0_4, %c0_5] : memref<128x128xf32, #tpu.memory_space<vmem>>, vector<128x128xf32>
    tpu.vector_store %arg8[%c0_4, %c0_5], %4 {strides = array<i32>} : memref<128x128xf32, #tpu.memory_space<vmem>>, vector<128x128xf32>,
    %c0_6 = arith.constant 0 : index
    %c0_7 = arith.constant 0 : index
    %6 = vector.load %arg4[%c0_6, %c0_7] : memref<128x1xi32, #tpu.memory_space<vmem>>, vector<128x1xi32>
    %c0_8 = arith.constant 0 : index
    %c0_9 = arith.constant 0 : index
    %7 = vector.load %arg5[%c0_8, %c0_9] : memref<1x128xi32, #tpu.memory_space<vmem>>, vector<1x128xi32>
    %8 = vector.broadcast %6 : vector<128x1xi32> to vector<128x128xi32>
    %9 = vector.broadcast %7 : vector<1x128xi32> to vector<128x128xi32>
    %10 = arith.cmpi eq, %8, %9 : vector<128x128xi32>
    %c0_10 = arith.constant 0 : index
    %c0_11 = arith.constant 0 : index
    %11 = vector.load %arg6[%c0_10, %c0_11] : memref<128x1xi32, #tpu.memory_space<vmem>>, vector<128x1xi32>
    %c0_12 = arith.constant 0 : index
    %c0_13 = arith.constant 0 : index
    %12 = vector.load %arg7[%c0_12, %c0_13] : memref<1x128xi32, #tpu.memory_space<vmem>>, vector<1x128xi32>
    %13 = vector.broadcast %11 : vector<128x1xi32> to vector<128x128xi32>
    %14 = vector.broadcast %12 : vector<1x128xi32> to vector<128x128xi32>
    %15 = arith.cmpi ne, %13, %14 : vector<128x128xi32>
    %16 = arith.andi %10, %15 : vector<128x128xi1>
    %cst_14 = arith.constant 28.5714283 : f32
    %17 = vector.broadcast %cst_14 : f32 to vector<128x128xf32>
    %18 = arith.addf %4, %17 : vector<128x128xf32>
    %cst_15 = arith.constant 0.000000e+00 : f32
    %19 = vector.broadcast %cst_15 : f32 to vector<128x128xf32>
    %20 = arith.select %16, %18, %19 : vector<128x128xi1>, vector<128x128xf32>
    %c0_16 = arith.constant 0 : index
    %c0_17 = arith.constant 0 : index
    %21 = vector.load %arg9[%c0_16, %c0_17] : memref<128x128xf32, #tpu.memory_space<vmem>>, vector<128x128xf32>
    tpu.vector_store %arg9[%c0_16, %c0_17], %20 {strides = array<i32>} : memref<128x128xf32, #tpu.memory_space<vmem>>, vector<128x128xf32>,
    return
  }
  func.func @transform_0(%arg0: i32, %arg1: i32) -> (i32, i32) {
    %c0_i32 = arith.constant 0 : i32
    %c0_i32_0 = arith.constant 0 : i32
    return %arg0, %c0_i32 : i32, i32
  }
  func.func @transform_1(%arg0: i32, %arg1: i32) -> (i32, i32) {
    %c0_i32 = arith.constant 0 : i32
    %c0_i32_0 = arith.constant 0 : i32
    return %arg1, %c0_i32 : i32, i32
  }
  func.func @transform_2(%arg0: i32, %arg1: i32) -> (i32, i32) {
    %c0_i32 = arith.constant 0 : i32
    %c0_i32_0 = arith.constant 0 : i32
    return %arg0, %c0_i32 : i32, i32
  }
  func.func @transform_3(%arg0: i32, %arg1: i32) -> (i32, i32) {
    %c0_i32 = arith.constant 0 : i32
    %c0_i32_0 = arith.constant 0 : i32
    return %c0_i32, %arg1 : i32, i32
  }
  func.func @transform_4(%arg0: i32, %arg1: i32) -> (i32, i32) {
    %c0_i32 = arith.constant 0 : i32
    %c0_i32_0 = arith.constant 0 : i32
    return %arg0, %c0_i32 : i32, i32
  }
  func.func @transform_5(%arg0: i32, %arg1: i32) -> (i32, i32) {
    %c0_i32 = arith.constant 0 : i32
    %c0_i32_0 = arith.constant 0 : i32
    return %c0_i32, %arg1 : i32, i32
  }
  func.func @transform_6(%arg0: i32, %arg1: i32) -> (i32, i32) {
    %c0_i32 = arith.constant 0 : i32
    return %arg0, %arg1 : i32, i32
  }
  func.func @transform_7(%arg0: i32, %arg1: i32) -> (i32, i32) {
    %c0_i32 = arith.constant 0 : i32
    return %arg0, %arg1 : i32, i32
  }
}

</mosaic_0001>

<bundles_post_ra>
// kernel: tpu_custom_call.1
= control target key start
LH: loop header
LB: loop body
LE: loop exit
PB: predicated region body
PF: predicated region fallthrough
CT: control target
= control target key end

     0   :  { %13 = vsyncpa [#allocation3], 0  ;;  %v675_v5 = vmov 0   ;;  %s1198_s0 = inlined_call_operand.vmem [shape: f32[128,128], index: 0, kind: input, shape index: {}]   ;;  %s1199_s1 = inlined_call_operand.vmem [shape: f32[128,128], index: 1, kind: input, shape index: {}]   ;;  %s1200_s2 = inlined_call_operand.vmem [shape: s32[128,1], index: 2, kind: input, shape index: {}]   ;;  %s1201_s3 = inlined_call_operand.vmem [shape: s32[1,128], index: 3, kind: input, shape index: {}]   ;;  %s1202_s4 = inlined_call_operand.vmem [shape: s32[128,1], index: 4, kind: input, shape index: {}]   ;;  %s1203_s5 = inlined_call_operand.vmem [shape: s32[1,128], index: 5, kind: input, shape index: {}]   ;;  %s1204_s6 = inlined_call_operand.hbm [shape: f32[128,128], index: 6, kind: output, shape index: {0}]   ;;  %s1205_s7 = inlined_call_operand.hbm [shape: f32[128,128], index: 7, kind: output, shape index: {1}]  }
   0x1   :  { %v58_v0 = vld [vmem:[%s1199_s1 + $0x78] sm:$0xff]  ;;  %v57_v1 = vld [vmem:[%s1199_s1 + $0x70] sm:$0xff]  ;;  %v236_v3 = vld [vmem:[%s1200_s2] sm:$0xff]  ;;  %630 = vset.pattern.permute.xlu1 %v675_v5  ;;  %629 = vset.pattern.permute.xlu0 %v675_v5 }
   0x2   :  { %536 = vmatprep.subr.mxu0 %v58_v0  ;;  %592 = vmatprep.subr.mxu1 %v58_v0  ;;  %v238_v2 = vld [vmem:[%s1200_s2 + $0x10] sm:$0xff]  ;;  %v56_v4 = vld [vmem:[%s1199_s1 + $0x68] sm:$0xff]  ;;  %v239_v6 = vld [vmem:[%s1200_s2 + $0x18] sm:$0xff] }
   0x3   :  { %537 = vmatpush3.xpose.msra.mxu0 %v58_v0  ;;  %608 = vmatpush3.xpose.msra.mxu1 %v58_v0  ;;  %v237_v7 = vld [vmem:[%s1200_s2 + $0x8] sm:$0xff]  ;;  %v55_v8 = vld [vmem:[%s1199_s1 + $0x60] sm:$0xff]  ;;  %v54_v13 = vld [vmem:[%s1199_s1 + $0x58] sm:$0xff] }
   0x4   :  { %538 = vmatprep.subr.mxu0 %v57_v1  ;;  %593 = vmatprep.subr.mxu1 %v57_v1  ;;  %v241_v9 = vld [vmem:[%s1200_s2 + $0x28] sm:$0xff]  ;;  %v240_v10 = vld [vmem:[%s1200_s2 + $0x20] sm:$0xff]  ;;  %v243_v14 = vld [vmem:[%s1200_s2 + $0x38] sm:$0xff] }
   0x5   :  { %260 = vperm.xlu1 %630, %v238_v2   ;;  %254 = vperm.xlu0 %629, %v236_v3   ;;  %v27_v11 = vld [vmem:[%s1198_s0] sm:$0xff]  ;;  %v242_v15 = vld [vmem:[%s1200_s2 + $0x30] sm:$0xff]  ;;  %v245_v17 = vld [vmem:[%s1200_s2 + $0x48] sm:$0xff] }
   0x6   :  { %v35_v12 = vld [vmem:[%s1198_s0 + $0x40] sm:$0xff]  ;;  %568 = vmatprep.mubr.f32.mxu0 %v27_v11  ;;  %v53_v16 = vld [vmem:[%s1199_s1 + $0x50] sm:$0xff]  ;;  %v52_v19 = vld [vmem:[%s1199_s1 + $0x48] sm:$0xff] }
   0x7   :  { %539 = vmatpush3.xpose.msra.mxu0 %v57_v1  ;;  %609 = vmatpush3.xpose.msra.mxu1 %v57_v1  ;;  %v244_v18 = vld [vmem:[%s1200_s2 + $0x40] sm:$0xff] }
   0x8   :  { %540 = vmatprep.subr.mxu0 %v56_v4  ;;  %594 = vmatprep.subr.mxu1 %v56_v4 }
   0x9   :  { %263 = vperm.xlu1 %630, %v239_v6   ;;  %257 = vperm.xlu0 %629, %v237_v7  }
   0xa   :  { %580 = vmatprep.mubr.f32.mxu1 %v35_v12 }
   0xb   :  { %541 = vmatpush3.xpose.msra.mxu0 %v56_v4  ;;  %610 = vmatpush3.xpose.msra.mxu1 %v56_v4 }
   0xc   :  { %542 = vmatprep.subr.mxu0 %v55_v8  ;;  %595 = vmatprep.subr.mxu1 %v55_v8 }
   0xd   :  { %269 = vperm.xlu1 %630, %v241_v9   ;;  %266 = vperm.xlu0 %629, %v240_v10  }
   0xf   :  { %543 = vmatpush3.xpose.msra.mxu0 %v55_v8  ;;  %611 = vmatpush3.xpose.msra.mxu1 %v55_v8 }
  0x10   :  { %544 = vmatprep.subr.mxu0 %v54_v13  ;;  %596 = vmatprep.subr.mxu1 %v54_v13 }
  0x11   :  { %275 = vperm.xlu1 %630, %v243_v14   ;;  %272 = vperm.xlu0 %629, %v242_v15  }
  0x13   :  { %545 = vmatpush3.xpose.msra.mxu0 %v54_v13  ;;  %612 = vmatpush3.xpose.msra.mxu1 %v54_v13 }
  0x14   :  { %546 = vmatprep.subr.mxu0 %v53_v16  ;;  %597 = vmatprep.subr.mxu1 %v53_v16 }
  0x15   :  { %281 = vperm.xlu1 %630, %v245_v17   ;;  %278 = vperm.xlu0 %629, %v244_v18  }
  0x16   :  { %14 = vsyncpa [#allocation5], 0  ;;  %v247_v20 = vld [vmem:[%s1200_s2 + $0x58] sm:$0xff]  ;;  %v246_v21 = vld [vmem:[%s1200_s2 + $0x50] sm:$0xff]  ;;  %s677_s11 = smov [#allocation4]  }
  0x17   :  { %547 = vmatpush3.xpose.msra.mxu0 %v53_v16  ;;  %613 = vmatpush3.xpose.msra.mxu1 %v53_v16  ;;  %v51_v22 = vld [vmem:[%s1199_s1 + $0x40] sm:$0xff]  ;;  %v249_v23 = vld [vmem:[%s1200_s2 + $0x68] sm:$0xff]  ;;  %v50_v25 = vld [vmem:[%s1199_s1 + $0x38] sm:$0xff]  ;;  %s487_s12 = sshll.u32 %s677_s11, 4  ;;  %s488_s12 = int_to_ptr.vmem [resolvable:$true] %s487_s12 }
  0x18   :  { %548 = vmatprep.subr.mxu0 %v52_v19  ;;  %598 = vmatprep.subr.mxu1 %v52_v19  ;;  %v248_v24 = vld [vmem:[%s1200_s2 + $0x60] sm:$0xff]  ;;  %v251_v26 = vld [vmem:[%s1200_s2 + $0x78] sm:$0xff]  ;;  %v250_v27 = vld [vmem:[%s1200_s2 + $0x70] sm:$0xff] }
  0x19   :  { %287 = vperm.xlu1 %630, %v247_v20   ;;  %284 = vperm.xlu0 %629, %v246_v21   ;;  %v49_v28 = vld [vmem:[%s1199_s1 + $0x30] sm:$0xff]  ;;  %v322_v29 = vld [vmem:[%s1202_s4 + $0x8] sm:$0xff]  ;;  %v321_v30 = vld [vmem:[%s1202_s4] sm:$0xff] }
  0x1a   :  { %v48_v31 = vld [vmem:[%s1199_s1 + $0x28] sm:$0xff]  ;;  %v324_v32 = vld [vmem:[%s1202_s4 + $0x18] sm:$0xff]  ;;  %v323_v33 = vld [vmem:[%s1202_s4 + $0x10] sm:$0xff] }
  0x1b   :  { %549 = vmatpush3.xpose.msra.mxu0 %v52_v19  ;;  %614 = vmatpush3.xpose.msra.mxu1 %v52_v19  ;;  %v47_v34 = vld [vmem:[%s1199_s1 + $0x20] sm:$0xff]  ;;  %v326_v35 = vld [vmem:[%s1202_s4 + $0x28] sm:$0xff]  ;;  %v46_v37 = vld [vmem:[%s1199_s1 + $0x18] sm:$0xff] }
  0x1c   :  { %550 = vmatprep.subr.mxu0 %v51_v22  ;;  %599 = vmatprep.subr.mxu1 %v51_v22  ;;  %v325_v36 = vld [vmem:[%s1202_s4 + $0x20] sm:$0xff]  ;;  %v328_v38 = vld [vmem:[%s1202_s4 + $0x38] sm:$0xff]  ;;  %v327_v39 = vld [vmem:[%s1202_s4 + $0x30] sm:$0xff] }
  0x1d   :  { %293 = vperm.xlu1 %630, %v249_v23   ;;  %290 = vperm.xlu0 %629, %v248_v24   ;;  %v45_v40 = vld [vmem:[%s1199_s1 + $0x10] sm:$0xff]  ;;  %v330_v41 = vld [vmem:[%s1202_s4 + $0x48] sm:$0xff]  ;;  %v329_v42 = vld [vmem:[%s1202_s4 + $0x40] sm:$0xff] }
  0x1e   :  { %v44_v43 = vld [vmem:[%s1199_s1 + $0x8] sm:$0xff]  ;;  %v332_v44 = vld [vmem:[%s1202_s4 + $0x58] sm:$0xff]  ;;  %v331_v45 = vld [vmem:[%s1202_s4 + $0x50] sm:$0xff] }
  0x1f   :  { %551 = vmatpush3.xpose.msra.mxu0 %v51_v22  ;;  %615 = vmatpush3.xpose.msra.mxu1 %v51_v22  ;;  %v43_v46 = vld [vmem:[%s1199_s1] sm:$0xff]  ;;  %v334_v47 = vld [vmem:[%s1202_s4 + $0x68] sm:$0xff]  ;;  %v29_v51 = vld [vmem:[%s1198_s0 + $0x10] sm:$0xff] }
  0x20   :  { %552 = vmatprep.subr.mxu0 %v50_v25  ;;  %600 = vmatprep.subr.mxu1 %v50_v25  ;;  %v333_v48 = vld [vmem:[%s1202_s4 + $0x60] sm:$0xff]  ;;  %v28_v49 = vld [vmem:[%s1198_s0 + $0x8] sm:$0xff]  ;;  %v37_v52 = vld [vmem:[%s1198_s0 + $0x50] sm:$0xff] }
  0x21   :  { %299 = vperm.xlu1 %630, %v251_v26   ;;  %296 = vperm.xlu0 %629, %v250_v27   ;;  %v36_v50 = vld [vmem:[%s1198_s0 + $0x48] sm:$0xff]  ;;  %v336_v53 = vld [vmem:[%s1202_s4 + $0x78] sm:$0xff]  ;;  %v335_v54 = vld [vmem:[%s1202_s4 + $0x70] sm:$0xff] }
  0x22   :  { %v30_v55 = vld [vmem:[%s1198_s0 + $0x18] sm:$0xff]  ;;  %v31_v57 = vld [vmem:[%s1198_s0 + $0x20] sm:$0xff]  ;;  %v32_v59 = vld [vmem:[%s1198_s0 + $0x28] sm:$0xff] }
  0x23   :  { %553 = vmatpush3.xpose.msra.mxu0 %v50_v25  ;;  %616 = vmatpush3.xpose.msra.mxu1 %v50_v25  ;;  %v38_v56 = vld [vmem:[%s1198_s0 + $0x58] sm:$0xff]  ;;  %v39_v58 = vld [vmem:[%s1198_s0 + $0x60] sm:$0xff]  ;;  %v40_v60 = vld [vmem:[%s1198_s0 + $0x68] sm:$0xff] }
  0x24   :  { %554 = vmatprep.subr.mxu0 %v49_v28  ;;  %601 = vmatprep.subr.mxu1 %v49_v28  ;;  %v33_v61 = vld [vmem:[%s1198_s0 + $0x30] sm:$0xff]  ;;  %v34_v63 = vld [vmem:[%s1198_s0 + $0x38] sm:$0xff]  ;;  %v955_v27 = vld [vmem:[%s1201_s3] ss:$0 sm:$0xff]  ;;  %s676_s3 = smov [#allocation2]  }
  0x25   :  { %342 = vperm.xlu1 %630, %v322_v29   ;;  %339 = vperm.xlu0 %629, %v321_v30   ;;  %v41_v62 = vld [vmem:[%s1198_s0 + $0x70] sm:$0xff]  ;;  %v42_v0 = vld [vmem:[%s1198_s0 + $0x78] sm:$0xff] }
  0x27   :  { %555 = vmatpush3.xpose.msra.mxu0 %v49_v28  ;;  %617 = vmatpush3.xpose.msra.mxu1 %v49_v28  ;;  %v960_v28 = vld [vmem:[%s1203_s5] ss:$0 sm:$0xff]  ;;  %s475_s5 = sshll.u32 %s676_s3, 4  ;;  %s476_s5 = int_to_ptr.vmem [resolvable:$true] %s475_s5 }
  0x28   :  { %556 = vmatprep.subr.mxu0 %v48_v31  ;;  %602 = vmatprep.subr.mxu1 %v48_v31  ;;  %s631_s13 = scalar_lea.vmem %s476_s5, 2048  ;;  %p636_p1 = scmp.lt.s32.totalorder %s476_s5, %s476_s5 }
  0x29   :  { %348 = vperm.xlu1 %630, %v324_v32   ;;  %345 = vperm.xlu0 %629, %v323_v33   ;;  %p632_p0 = scmp.ne.s32.totalorder %s476_s5, %s631_s13  ;;  %p637_p2 = scmp.lt.s32.totalorder %s631_s13, %s631_s13 }
  0x2b   :  { %557 = vmatpush3.xpose.msra.mxu0 %v48_v31  ;;  %618 = vmatpush3.xpose.msra.mxu1 %v48_v31  ;;  %p638_p3 = por %p637_p2, %p636_p1 }
  0x2c   :  { %558 = vmatprep.subr.mxu0 %v47_v34  ;;  %603 = vmatprep.subr.mxu1 %v47_v34 }
  0x2d   :  { %354 = vperm.xlu1 %630, %v326_v35   ;;  %351 = vperm.xlu0 %629, %v325_v36   ;;  %p639_p4 = pnand %p638_p3, %p632_p0 }
  0x2f   :  { %559 = vmatpush3.xpose.msra.mxu0 %v47_v34  ;;  %619 = vmatpush3.xpose.msra.mxu1 %v47_v34 }
  0x30   :  { %560 = vmatprep.subr.mxu0 %v46_v37  ;;  %604 = vmatprep.subr.mxu1 %v46_v37 }
  0x31   :  { %360 = vperm.xlu1 %630, %v328_v38   ;;  %357 = vperm.xlu0 %629, %v327_v39  }
  0x33   :  { %561 = vmatpush3.xpose.msra.mxu0 %v46_v37  ;;  %620 = vmatpush3.xpose.msra.mxu1 %v46_v37 }
  0x34   :  { %562 = vmatprep.subr.mxu0 %v45_v40  ;;  %605 = vmatprep.subr.mxu1 %v45_v40 }
  0x35   :  { %366 = vperm.xlu1 %630, %v330_v41   ;;  %363 = vperm.xlu0 %629, %v329_v42  }
  0x37   :  { %563 = vmatpush3.xpose.msra.mxu0 %v45_v40  ;;  %621 = vmatpush3.xpose.msra.mxu1 %v45_v40 }
  0x38   :  { %564 = vmatprep.subr.mxu0 %v44_v43  ;;  %606 = vmatprep.subr.mxu1 %v44_v43 }
  0x39   :  { %372 = vperm.xlu1 %630, %v332_v44   ;;  %369 = vperm.xlu0 %629, %v331_v45  }
  0x3b   :  { %565 = vmatpush3.xpose.msra.mxu0 %v44_v43  ;;  %622 = vmatpush3.xpose.msra.mxu1 %v44_v43 }
  0x3c   :  { %566 = vmatprep.subr.mxu0 %v43_v46  ;;  %607 = vmatprep.subr.mxu1 %v43_v46 }
  0x3d   :  { %378 = vperm.xlu1 %630, %v334_v47   ;;  %375 = vperm.xlu0 %629, %v333_v48  }
  0x3f   :  { %567 = vmatpush3.xpose.msra.mxu0 %v43_v46  ;;  %623 = vmatpush3.xpose.msra.mxu1 %v43_v46 }
  0x41   :  { %384 = vperm.xlu1 %630, %v336_v53   ;;  %381 = vperm.xlu0 %629, %v335_v54  }
  0x42   :  { %569 = vmatmul.mubr.f32.vlgmr.msra.gmra.mxu0 %v28_v49  ;;  %581 = vmatmul.mubr.f32.vlgmr.msra.gmra.mxu1 %v36_v50 }
  0x43   :  { %571 = vmatprep.mubr.f32.mxu0 %v29_v51  ;;  %583 = vmatprep.mubr.f32.mxu1 %v37_v52 }
  0x46   :  { %572 = vmatmul.mubr.f32.gmra.mxu0 %v30_v55  ;;  %584 = vmatmul.mubr.f32.gmra.mxu1 %v38_v56 }
  0x47   :  { %574 = vmatprep.mubr.f32.mxu0 %v31_v57  ;;  %586 = vmatprep.mubr.f32.mxu1 %v39_v58 }
  0x4a   :  { %575 = vmatmul.mubr.f32.gmra.mxu0 %v32_v59  ;;  %587 = vmatmul.mubr.f32.gmra.mxu1 %v40_v60 }
  0x4b   :  { %577 = vmatprep.mubr.f32.mxu0 %v33_v61  ;;  %589 = vmatprep.mubr.f32.mxu1 %v41_v62 }
  0x4e   :  { %578 = vmatmul.mubr.f32.gmra.mxu0 %v34_v63  ;;  %590 = vmatmul.mubr.f32.gmra.mxu1 %v42_v0 }
  0x80   :  { %v912_v1 = vpop.permute.xlu1 %260  ;;  %v914_v2 = vpop.permute.xlu0 %254 }
  0x81   :  { %vm307_vm0 = vcmp.eq.s32.totalorder %v912_v1, %v955_v27  ;;  %vm305_vm1 = vcmp.eq.s32.totalorder %v914_v2, %v955_v27 }
  0x84   :  { %v916_v3 = vpop.permute.xlu1 %263  ;;  %v258_v4 = vpop.permute.xlu0 %257 }
  0x85   :  { %vm308_vm2 = vcmp.eq.s32.totalorder %v916_v3, %v955_v27  ;;  %vm306_vm3 = vcmp.eq.s32.totalorder %v258_v4, %v955_v27 }
  0x88   :  { %v918_v5 = vpop.permute.xlu1 %269  ;;  %v920_v6 = vpop.permute.xlu0 %266 }
  0x89   :  { %vm310_vm5 = vcmp.eq.s32.totalorder %v918_v5, %v955_v27 }
  0x8c   :  { %v922_v7 = vpop.permute.xlu1 %275  ;;  %v924_v8 = vpop.permute.xlu0 %272 }
  0x8d   :  { %vm312_vm11 = vcmp.eq.s32.totalorder %v922_v7, %v955_v27 }
  0x90   :  { %v282_v9 = vpop.permute.xlu1 %281  ;;  %v926_v10 = vpop.permute.xlu0 %278 }
  0x91   :  { %vm314_vm6 = vcmp.eq.s32.totalorder %v282_v9, %v955_v27  ;;  %vm313_vm8 = vcmp.eq.s32.totalorder %v926_v10, %v955_v27 }
  0x94   :  { %v928_v11 = vpop.permute.xlu1 %287  ;;  %v930_v12 = vpop.permute.xlu0 %284 }
  0x95   :  { %vm316_vm9 = vcmp.eq.s32.totalorder %v928_v11, %v955_v27  ;;  %vm315_vm10 = vcmp.eq.s32.totalorder %v930_v12, %v955_v27 }
  0x98   :  { %v932_v13 = vpop.permute.xlu1 %293  ;;  %v934_v14 = vpop.permute.xlu0 %290 }
  0x99   :  { %vm317_vm15 = vcmp.eq.s32.totalorder %v934_v14, %v955_v27 }
  0x9c   :  { %v936_v15 = vpop.permute.xlu1 %299  ;;  %v938_v16 = vpop.permute.xlu0 %296 }
  0xa0   :  { %v343_v17 = vpop.permute.xlu1 %342  ;;  %v340_v18 = vpop.permute.xlu0 %339 }
  0xa1   :  { %vm391_vm4 = vcmp.ne.s32.totalorder %v343_v17, %v960_v28  ;;  %vm390_vm14 = vcmp.ne.s32.totalorder %v340_v18, %v960_v28 }
  0xa2   :  { %vm992_vm13 = vmand %vm306_vm3, %vm391_vm4 }
  0xa4   :  { %v940_v19 = vpop.permute.xlu1 %348  ;;  %v942_v20 = vpop.permute.xlu0 %345 }
  0xa5   :  { %vm393_vm12 = vcmp.ne.s32.totalorder %v940_v19, %v960_v28 }
  0xa8   :  { %v944_v21 = vpop.permute.xlu1 %354  ;;  %v946_v22 = vpop.permute.xlu0 %351 }
  0xac   :  { %v948_v23 = vpop.permute.xlu1 %360  ;;  %v950_v24 = vpop.permute.xlu0 %357 }
  0xb0   :  { %v367_v25 = vpop.permute.xlu1 %366  ;;  %v364_v26 = vpop.permute.xlu0 %363 }
  0xb1   :  { %vm399_vm7 = vcmp.ne.s32.totalorder %v367_v25, %v960_v28  ;;  %vm398_vm4 = vcmp.ne.s32.totalorder %v364_v26, %v960_v28 }
  0xb2   :  { %vm1005_vm3 = vmand %vm314_vm6, %vm399_vm7  ;;  %vm392_vm6 = vcmp.ne.s32.totalorder %v942_v20, %v960_v28 }
  0xb3   :  { %vm1025_vm7 = vmand %vm305_vm1, %vm390_vm14  ;;  %vm319_vm14 = vcmp.eq.s32.totalorder %v938_v16, %v955_v27 }
  0xb4   :  { %v964_v29 = vpop.permute.xlu1 %372  ;;  %v976_v32 = vpop.permute.xlu0 %369  ;;  %vm1040_vm1 = vmand %vm313_vm8, %vm398_vm4 }
  0xb5   :  { %vm1056_vm8 = vmand %vm308_vm2, %vm393_vm12  ;;  %vm400_vm4 = vcmp.ne.s32.totalorder %v976_v32, %v960_v28 }
  0xb6   :  { %vm1084_vm12 = vmand %vm307_vm0, %vm392_vm6 }
  0xb7   :  { %vm1100_vm0 = vmand %vm315_vm10, %vm400_vm4  ;;  %vm1227_vm4 = vcmp.eq.s32.totalorder %v920_v6, %v955_v27 }
  0xb8   :  { %v1012_v45 = vpop.permute.xlu1 %378  ;;  %v1044_v56 = vpop.permute.xlu0 %375 }
  0xb9   :  { %vm402_vm10 = vcmp.ne.s32.totalorder %v1044_v56, %v960_v28 }
  0xbc   :  { %v385_v20 = vpop.permute.xlu1 %384 }
 0x102   :  { %v570_v30 = vpop.f32.mrf.mxu0  ;;  %v582_v31 = vpop.f32.mrf.mxu1 }
 0x103   :  { %v205_v33 = vmul.f32 14.285714, %v570_v30  ;;  %v213_v34 = vmul.f32 14.285714, %v582_v31 }
 0x104   :  { %v125_v35 = vpop.f32.mrf.mxu0  ;;  %v165_v36 = vpop.f32.mrf.mxu1 }
 0x105   :  { %221 = vst [vmem:[#allocation2 + $0x8] sm:$0xff] %v205_v33  ;;  %v423_v38 = vadd.f32 28.571428, %v205_v33  ;;  %229 = vst [vmem:[#allocation2 + $0x48] sm:$0xff] %v213_v34  ;;  %v431_v39 = vadd.f32 28.571428, %v213_v34 }
 0x106   :  { %v204_v40 = vmul.f32 14.285714, %v125_v35  ;;  %v212_v42 = vmul.f32 14.285714, %v165_v36  ;;  %v573_v43 = vpop.f32.mrf.mxu0  ;;  %v585_v44 = vpop.f32.mrf.mxu1 }
 0x107   :  { %v439_v46 = vsel %vm992_vm13, %v423_v38, 0.0  ;;  %v447_v47 = vsel %vm1005_vm3, %v431_v39, 0.0  ;;  %v207_v49 = vmul.f32 14.285714, %v573_v43  ;;  %vm401_vm13 = vcmp.ne.s32.totalorder %v964_v29, %v960_v28 }
 0x108   :  { %220 = vst [vmem:[#allocation2] sm:$0xff] %v204_v40  ;;  %v422_v48 = vadd.f32 28.571428, %v204_v40  ;;  %455 = vst [vmem:[#allocation4 + $0x8] sm:$0xff] %v439_v46  ;;  %v430_v51 = vadd.f32 28.571428, %v212_v42  ;;  %v135_v53 = vpop.f32.mrf.mxu0  ;;  %v175_v54 = vpop.f32.mrf.mxu1  ;;  %vm311_vm3 = vcmp.eq.s32.totalorder %v924_v8, %v955_v27 }
 0x109   :  { %463 = vst [vmem:[#allocation4 + $0x48] sm:$0xff] %v447_v47  ;;  %228 = vst [vmem:[#allocation2 + $0x40] sm:$0xff] %v212_v42  ;;  %v215_v52 = vmul.f32 14.285714, %v585_v44  ;;  %v425_v58 = vadd.f32 28.571428, %v207_v49 }
 0x10a   :  { %v438_v57 = vsel %vm1025_vm7, %v422_v48, 0.0  ;;  %223 = vst [vmem:[#allocation2 + $0x18] sm:$0xff] %v207_v49  ;;  %v206_v59 = vmul.f32 14.285714, %v135_v53  ;;  %v446_v61 = vsel %vm1040_vm1, %v430_v51, 0.0  ;;  %v576_v0 = vpop.f32.mrf.mxu0  ;;  %v588_v2 = vpop.f32.mrf.mxu1  ;;  %vm395_vm7 = vcmp.ne.s32.totalorder %v944_v21, %v960_v28  ;;  %vm1072_vm2 = vmand %vm316_vm9, %vm401_vm13 }
 0x10b   :  { %454 = vst [vmem:[#allocation4] sm:$0xff] %v438_v57  ;;  %231 = vst [vmem:[#allocation2 + $0x58] sm:$0xff] %v215_v52  ;;  %v433_v62 = vadd.f32 28.571428, %v215_v52  ;;  %v214_v63 = vmul.f32 14.285714, %v175_v54  ;;  %vm403_vm9 = vcmp.ne.s32.totalorder %v1012_v45, %v960_v28  ;;  %vm394_vm13 = vcmp.ne.s32.totalorder %v946_v22, %v960_v28  ;;  %v382_v21 = vpop.permute.xlu0 %381 }
 0x10c   :  { %462 = vst [vmem:[#allocation4 + $0x40] sm:$0xff] %v446_v61  ;;  %v441_v4 = vsel %vm1056_vm8, %v425_v58, 0.0  ;;  %222 = vst [vmem:[#allocation2 + $0x10] sm:$0xff] %v206_v59  ;;  %v424_v9 = vadd.f32 28.571428, %v206_v59  ;;  %v145_v25 = vpop.f32.mrf.mxu0  ;;  %v185_v26 = vpop.f32.mrf.mxu1  ;;  %vm397_vm1 = vcmp.ne.s32.totalorder %v948_v23, %v960_v28 }
 0x10d   :  { %v209_v10 = vmul.f32 14.285714, %v576_v0  ;;  %457 = vst [vmem:[#allocation4 + $0x18] sm:$0xff] %v441_v4  ;;  %v449_v11 = vsel %vm1072_vm2, %v433_v62, 0.0  ;;  %230 = vst [vmem:[#allocation2 + $0x50] sm:$0xff] %v214_v63  ;;  %vm405_vm2 = vcmp.ne.s32.totalorder %v385_v20, %v960_v28 }
 0x10e   :  { %v432_v18 = vadd.f32 28.571428, %v214_v63  ;;  %v217_v19 = vmul.f32 14.285714, %v588_v2  ;;  %465 = vst [vmem:[#allocation4 + $0x58] sm:$0xff] %v449_v11  ;;  %v440_v29 = vsel %vm1084_vm12, %v424_v9, 0.0  ;;  %vm1112_vm6 = vmand %vm310_vm5, %vm395_vm7  ;;  %v579_v35 = vpop.f32.mrf.mxu0  ;;  %v591_v36 = vpop.f32.mrf.mxu1  ;;  %vm1224_vm5 = vcmp.eq.s32.totalorder %v932_v13, %v955_v27 }
 0x10f   :  { %225 = vst [vmem:[#allocation2 + $0x28] sm:$0xff] %v209_v10  ;;  %v427_v30 = vadd.f32 28.571428, %v209_v10  ;;  %v208_v31 = vmul.f32 14.285714, %v145_v25  ;;  %456 = vst [vmem:[#allocation4 + $0x10] sm:$0xff] %v440_v29  ;;  %vm396_vm12 = vcmp.ne.s32.totalorder %v950_v24, %v960_v28 }
 0x110   :  { %v448_v32 = vsel %vm1100_vm0, %v432_v18, 0.0  ;;  %233 = vst [vmem:[#allocation2 + $0x68] sm:$0xff] %v217_v19  ;;  %v435_v33 = vadd.f32 28.571428, %v217_v19  ;;  %v216_v34 = vmul.f32 14.285714, %v185_v26  ;;  %vm1128_vm8 = vmand %vm1224_vm5, %vm403_vm9  ;;  %v155_v43 = vpop.f32.mrf.mxu0  ;;  %v195_v44 = vpop.f32.mrf.mxu1  ;;  %vm404_vm0 = vcmp.ne.s32.totalorder %v382_v21, %v960_v28 }
 0x111   :  { %464 = vst [vmem:[#allocation4 + $0x50] sm:$0xff] %v448_v32  ;;  %v443_v37 = vsel %vm1112_vm6, %v427_v30, 0.0  ;;  %224 = vst [vmem:[#allocation2 + $0x20] sm:$0xff] %v208_v31  ;;  %v426_v38 = vadd.f32 28.571428, %v208_v31 }
 0x112   :  { %v211_v39 = vmul.f32 14.285714, %v579_v35  ;;  %vm1140_vm7 = vmand %vm1227_vm4, %vm394_vm13  ;;  %459 = vst [vmem:[#allocation4 + $0x28] sm:$0xff] %v443_v37  ;;  %v451_v40 = vsel %vm1128_vm8, %v435_v33, 0.0  ;;  %v434_v41 = vadd.f32 28.571428, %v216_v34 }
 0x113   :  { %232 = vst [vmem:[#allocation2 + $0x60] sm:$0xff] %v216_v34  ;;  %v219_v42 = vmul.f32 14.285714, %v591_v36  ;;  %vm1155_vm9 = vmand %vm317_vm15, %vm402_vm10  ;;  %v442_v22 = vsel %vm1140_vm7, %v426_v38, 0.0  ;;  %v210_v46 = vmul.f32 14.285714, %v155_v43  ;;  %vm1232_vm15 = vcmp.eq.s32.totalorder %v936_v15, %v955_v27 }
 0x114   :  { %467 = vst [vmem:[#allocation4 + $0x68] sm:$0xff] %v451_v40  ;;  %227 = vst [vmem:[#allocation2 + $0x38] sm:$0xff] %v211_v39  ;;  %v429_v45 = vadd.f32 28.571428, %v211_v39  ;;  %v450_v14 = vsel %vm1155_vm9, %v434_v41, 0.0 }
 0x115   :  { %vm413_vm13 = vmand %vm312_vm11, %vm397_vm1  ;;  %458 = vst [vmem:[#allocation4 + $0x20] sm:$0xff] %v442_v22  ;;  %v437_v47 = vadd.f32 28.571428, %v219_v42  ;;  %v218_v48 = vmul.f32 14.285714, %v195_v44 }
 0x116   :  { %235 = vst [vmem:[#allocation2 + $0x78] sm:$0xff] %v219_v42  ;;  %vm421_vm6 = vmand %vm1232_vm15, %vm405_vm2  ;;  %v445_v23 = vsel %vm413_vm13, %v429_v45, 0.0  ;;  %v428_v7 = vadd.f32 28.571428, %v210_v46 }
 0x117   :  { %466 = vst [vmem:[#allocation4 + $0x60] sm:$0xff] %v450_v14  ;;  %226 = vst [vmem:[#allocation2 + $0x30] sm:$0xff] %v210_v46  ;;  %v453_v50 = vsel %vm421_vm6, %v437_v47, 0.0  ;;  %v436_v51 = vadd.f32 28.571428, %v218_v48 }
 0x118   :  { %vm1181_vm11 = vmand %vm311_vm3, %vm396_vm12  ;;  %461 = vst [vmem:[#allocation4 + $0x38] sm:$0xff] %v445_v23 }
 0x119   :  { %234 = vst [vmem:[#allocation2 + $0x70] sm:$0xff] %v218_v48  ;;  %vm420_vm10 = vmand %vm319_vm14, %vm404_vm0  ;;  %v444_v15 = vsel %vm1181_vm11, %v428_v7, 0.0 }
 0x11a   :  { %469 = vst [vmem:[#allocation4 + $0x78] sm:$0xff] %v453_v50 }
 0x11b   :  { %642 = shalt.err (!%p639_p4)
}
 0x11c   :  { %s678_s14 = smov 128   ;;  %s679_s2 = smov 8   ;;  %460 = vst [vmem:[#allocation4 + $0x30] sm:$0xff] %v444_v15  ;;  %v452_v8 = vsel %vm420_vm10, %v436_v51, 0.0 }
 0x11d   :  { %481 = dma.vmem_to_hbm [thread:$0]  %s476_s5, 2048, %s1204_s6, [#allocation3], %s678_s14, %s678_s14, %s679_s2   ;;  %468 = vst [vmem:[#allocation4 + $0x70] sm:$0xff] %v452_v8 }
 0x11e   :  { %s651_s17 = scalar_lea.vmem %s488_s12, 2048  ;;  %p656_p6 = scmp.lt.s32.totalorder %s488_s12, %s488_s12 }
 0x11f   :  { %p652_p5 = scmp.ne.s32.totalorder %s488_s12, %s651_s17  ;;  %p657_p7 = scmp.lt.s32.totalorder %s651_s17, %s651_s17 }
 0x121   :  { %p658_p8 = por %p657_p7, %p656_p6 }
 0x123   :  { %p659_p9 = pnand %p658_p8, %p652_p5 }
 0x125   :  { %662 = shalt.err (!%p659_p9)
}
 0x126   :  { %493 = dma.vmem_to_hbm [thread:$0]  %s488_s12, 2048, %s1205_s7, [#allocation5], %s678_s14, %s678_s14, %s679_s2  }
 0x127   :  { %671 = dma.done.wait [#allocation3], 2048  }
 0x128   :  { %672 = vsyncadd [#allocation3], 4294965248 }
 0x129   :  { %673 = dma.done.wait [#allocation5], 2048  }
 0x12a   :  { %674 = vsyncadd [#allocation5], 4294965248 }
 0x12b   :  { %500 = vsyncpa [#allocation3], 1 }
 0x12c   :  { %501 = vsyncpa [#allocation5], 1 }

</bundles_post_ra>
